<compile_context>
chip_gen: v6e
topology: v6e:2x2x1
jax: 0.10.0
libtpu: 0.0.40
codegen_flags: <defaults>
</compile_context>

<pallas_src>
import functools

import numpy as np
import jax
import jax.numpy as jnp
from jax import lax
from jax.experimental import pallas as pl
from jax.experimental.pallas import tpu as pltpu


def _round_up(a, b):
    return (a + b - 1) // b * b


# ----------------------------------------------------------------------------
# Parameter ("weight") construction: deterministic replica of randomize()
# ----------------------------------------------------------------------------
def build_affine_2d(seed=0,
                    degrees=(-180, 180),
                    translate=(-0.5, 0.5),
                    scale=(0.9, 1.1),
                    shear=(-0.03, 0.03),
                    flip=True):
    rng = np.random.RandomState(seed)
    ndims = 2

    rot = np.deg2rad(rng.uniform(*degrees, size=ndims))
    rotate_matrix = np.array(
        [[np.cos(rot[0]), -np.sin(rot[0]), 0],
         [np.sin(rot[0]),  np.cos(rot[0]), 0],
         [0, 0, 1]])

    t = rng.uniform(*translate, size=ndims)
    translate_matrix = np.eye(ndims + 1)
    translate_matrix[:-1, -1] = t

    s = rng.uniform(*scale, size=ndims)
    scale_matrix = np.diag(np.append(s, [1]))

    sh = rng.uniform(*shear, size=(ndims, ndims))
    shear_matrix = np.eye(ndims + 1)
    shear_matrix[:-1, :-1] = sh
    for i in range(ndims):
        shear_matrix[i, i] = 1

    if flip:
        f = np.sign(rng.normal(size=ndims))
        flip_matrix = np.diag(np.append(f, [1]))
    else:
        flip_matrix = np.eye(ndims + 1)

    affine = rotate_matrix.dot(translate_matrix).dot(scale_matrix) \
                          .dot(shear_matrix).dot(flip_matrix)
    return affine.astype(np.float32)


# ----------------------------------------------------------------------------
# Host-side geometry precompute (per-output-pixel corners/weights + K band)
# ----------------------------------------------------------------------------
def _precompute_geometry(affine, H, W, hw_pad, tile_p):
    """Returns
      tgt8   : (8, hw_pad) int32   rows 0..3 = corner flat input index RELATIVE
               to the owning p-tile's band start (-1 = invalid -> zero padding)
      wts8   : (8, hw_pad) float32 rows 0..3 = matching bilinear weights
      kstart : (n_p,) int32        128-aligned band start per output p-tile
      k_band : python int          static band length (multiple of 128, <= hw_pad)
    """
    theta = np.asarray(affine, np.float64)[:2, :3]
    HW = H * W
    p = np.arange(hw_pad)
    jj = (p % W).astype(np.float64)
    ii = (p // W).astype(np.float64)
    xo = (2.0 * jj + 1.0) / W - 1.0          # align_corners=False pixel centres
    yo = (2.0 * ii + 1.0) / H - 1.0
    xs = theta[0, 0] * xo + theta[0, 1] * yo + theta[0, 2]
    ys = theta[1, 0] * xo + theta[1, 1] * yo + theta[1, 2]
    ix = ((xs + 1.0) * W - 1.0) * 0.5        # grid_sample un-normalization
    iy = ((ys + 1.0) * H - 1.0) * 0.5
    ix0 = np.floor(ix).astype(np.int64)
    iy0 = np.floor(iy).astype(np.int64)
    wx1 = ix - ix0
    wy1 = iy - iy0
    corners = [(iy0,     ix0,     (1.0 - wy1) * (1.0 - wx1)),
               (iy0,     ix0 + 1, (1.0 - wy1) * wx1),
               (iy0 + 1, ix0,     wy1 * (1.0 - wx1)),
               (iy0 + 1, ix0 + 1, wy1 * wx1)]

    out_valid = p < HW                       # padded output columns -> zeros
    tgt = np.full((4, hw_pad), -1, np.int64)
    wts = np.zeros((4, hw_pad), np.float64)
    for c, (yi, xi, wc) in enumerate(corners):
        v = out_valid & (yi >= 0) & (yi < H) & (xi >= 0) & (xi < W)
        tgt[c] = np.where(v, yi * W + xi, -1)
        wts[c] = np.where(v, wc, 0.0)

    # Per p-tile flat-input band (min/max touched index, 128-aligned start).
    n_p = hw_pad // tile_p
    starts = np.zeros(n_p, np.int64)
    extents = np.zeros(n_p, np.int64)
    for t in range(n_p):
        tt = tgt[:, t * tile_p:(t + 1) * tile_p]
        hit = tt >= 0
        if hit.any():
            lo = int(tt[hit].min())
            hi = int(tt[hit].max())
            starts[t] = (lo // 128) * 128
            extents[t] = hi - starts[t] + 1
    k_band = int(min(hw_pad, _round_up(max(int(extents.max()), 1), 128)))
    starts = np.minimum(starts, hw_pad - k_band)     # keep window in bounds

    rel = np.where(tgt >= 0, tgt - np.repeat(starts, tile_p)[None, :], -1)

    tgt8 = np.full((8, hw_pad), -1, np.int32)        # pad to 8 sublanes
    tgt8[:4] = rel.astype(np.int32)
    wts8 = np.zeros((8, hw_pad), np.float32)
    wts8[:4] = wts.astype(np.float32)
    return tgt8, wts8, starts.astype(np.int32), k_band


# ----------------------------------------------------------------------------
# Pallas kernel
# ----------------------------------------------------------------------------
def affine_sample_kernel(kstart_ref, tgt_ref, w_ref, x_hbm, o_ref,
                         xband_ref, copy_sem, *, k_band, tile_bc):
    # kstart_ref : SMEM (n_p,) i32   scalar-prefetched band starts
    # tgt_ref    : VMEM (8, tile_p) i32   rows 0..3 = band-relative corner idx
    # w_ref      : VMEM (8, tile_p) f32   rows 0..3 = bilinear weights
    # x_hbm      : HBM  (bc_pad, hw_pad) bf16 image slab (memory_space=ANY)
    # o_ref      : VMEM (tile_bc, tile_p) output tile
    # xband_ref  : VMEM (tile_bc, k_band) bf16 scratch (fetched input band)
    # copy_sem   : DMA semaphore (1,)
    bi = pl.program_id(0)
    pi = pl.program_id(1)

    kstart = pl.multiple_of(kstart_ref[pi], 128)
    row0 = pl.multiple_of(bi * tile_bc, tile_bc)

    # Fetch only the touched input band for this (bc tile, p tile).
    cp = pltpu.make_async_copy(
        x_hbm.at[pl.ds(row0, tile_bc), pl.ds(kstart, k_band)],
        xband_ref, copy_sem.at[0])
    cp.start()

    # Build the band-restricted sampling matrix while the DMA is in flight.
    # Pure compare/select; weight math stays f32 (no bf16 VALU on v5e).
    tile_p = o_ref.shape[1]
    tgt = tgt_ref[...]
    w = w_ref[...]
    q = lax.broadcasted_iota(jnp.int32, (k_band, tile_p), 0)   # band-relative idx
    # The four corners are distinct flat pixels per output column (when valid),
    # so later selects overwrite instead of accumulating; -1 never matches q.
    st = jnp.where(q == tgt[0:1, :], w[0:1, :], 0.0)
    st = jnp.where(q == tgt[1:2, :], w[1:2, :], st)
    st = jnp.where(q == tgt[2:3, :], w[2:3, :], st)
    st = jnp.where(q == tgt[3:4, :], w[3:4, :], st)
    st = st.astype(jnp.bfloat16)

    cp.wait()
    # bf16 x bf16 -> f32 MXU matmul over the K band only.
    o_ref[...] = jnp.dot(xband_ref[...], st,
                         preferred_element_type=jnp.float32).astype(o_ref.dtype)


# ----------------------------------------------------------------------------
# Wrapper
# ----------------------------------------------------------------------------
def random_affine_forward(batch, affine, *, tile_p=None, tile_bc=128):
    """batch: (B, C, H, W) float32 (NCHW), affine: (3, 3) homogeneous matrix."""
    B, C, H, W = batch.shape
    BC, HW = B * C, H * W

    if tile_p is None:
        # 256-wide MXU tiles on v6e/v7x, but only if that still leaves >=2
        # p-tiles so v7x's two TensorCores both get work; else 128.
        tile_p = 256 if _round_up(HW, 256) >= 2 * 256 else 128
    tile_p = max(128, _round_up(int(tile_p), 128))
    hw_pad = _round_up(HW, tile_p)
    n_p = hw_pad // tile_p

    bc_pad = _round_up(BC, 16)                 # bf16 packs 2 rows per sublane
    tile_bc = min(_round_up(int(tile_bc), 16), bc_pad)
    bc_pad = _round_up(bc_pad, tile_bc)
    n_bc = bc_pad // tile_bc

    tgt8, wts8, kstarts, k_band = _precompute_geometry(affine, H, W, hw_pad, tile_p)

    # Image as a (BC, HW) slab, zero-padded, bf16 for the MXU (halves HBM DMA).
    xf = batch.reshape(BC, HW).astype(jnp.bfloat16)
    xf = jnp.pad(xf, ((0, bc_pad - BC), (0, hw_pad - HW)))

    # VMEM budget from the actual footprint (+ slack for St build temporaries),
    # clamped to the chip's physical VMEM, never below the real need.
    need = (2 * 2 * 8 * tile_p * 4             # tgt / wts blocks, double-buffered
            + 2 * tile_bc * tile_p * 4         # output blocks, double-buffered
            + tile_bc * k_band * 2             # x band scratch
            + k_band * tile_p * 16)            # St build temporaries (iota/f32/bf16)
    try:
        cap = int(pltpu.get_tpu_info().vmem_capacity_bytes)
    except Exception:
        cap = 64 * 2 ** 20                     # conservative (v7x per-core VMEM)
    vmem_limit = max(2 * need, 32 * 2 ** 20)
    vmem_limit = min(vmem_limit, (cap * 3) // 4)
    vmem_limit = int(max(vmem_limit, need + (2 << 20)))

    grid_spec = pltpu.PrefetchScalarGridSpec(
        num_scalar_prefetch=1,                 # kstarts -> SMEM
        grid=(n_bc, n_p),
        in_specs=[
            pl.BlockSpec((8, tile_p), lambda bi, pi, ks: (0, pi)),   # rel targets
            pl.BlockSpec((8, tile_p), lambda bi, pi, ks: (0, pi)),   # weights
            pl.BlockSpec(memory_space=pl.ANY),                       # image slab (HBM)
        ],
        out_specs=pl.BlockSpec((tile_bc, tile_p), lambda bi, pi, ks: (bi, pi)),
        scratch_shapes=[
            pltpu.VMEM((tile_bc, k_band), jnp.bfloat16),             # x band buffer
            pltpu.SemaphoreType.DMA((1,)),
        ],
    )

    out = pl.pallas_call(
        functools.partial(affine_sample_kernel, k_band=k_band, tile_bc=tile_bc),
        out_shape=jax.ShapeDtypeStruct((bc_pad, hw_pad), batch.dtype),
        grid_spec=grid_spec,
        compiler_params=pltpu.CompilerParams(
            dimension_semantics=("parallel", "parallel"),
            vmem_limit_bytes=vmem_limit),
    )(jnp.asarray(kstarts, jnp.int32),
      jnp.asarray(tgt8), jnp.asarray(wts8), xf)

    return out[:BC, :HW].reshape(B, C, H, W)


# ----------------------------------------------------------------------------
# Reference (numpy, f64 coordinate math, explicit gather) for correctness.
# ----------------------------------------------------------------------------
def reference_forward(batch, affine):
    x = np.asarray(batch, np.float64)
    B, C, H, W = x.shape
    theta = np.asarray(affine, np.float64)[:2, :3]
    j = np.arange(W, dtype=np.float64)[None, :]
    i = np.arange(H, dtype=np.float64)[:, None]
    xo = (2.0 * j + 1.0) / W - 1.0
    yo = (2.0 * i + 1.0) / H - 1.0
    xs = theta[0, 0] * xo + theta[0, 1] * yo + theta[0, 2]
    ys = theta[1, 0] * xo + theta[1, 1] * yo + theta[1, 2]
    ix = ((xs + 1.0) * W - 1.0) * 0.5
    iy = ((ys + 1.0) * H - 1.0) * 0.5
    ix0 = np.floor(ix).astype(np.int64)
    iy0 = np.floor(iy).astype(np.int64)
    wx1 = ix - ix0
    wy1 = iy - iy0
    wx0 = 1.0 - wx1
    wy0 = 1.0 - wy1
    ix1 = ix0 + 1
    iy1 = iy0 + 1

    def sample(yi, xi):
        valid = (yi >= 0) & (yi < H) & (xi >= 0) & (xi < W)
        yc = np.clip(yi, 0, H - 1)
        xc = np.clip(xi, 0, W - 1)
        v = x[..., yc, xc]
        return np.where(valid, v, 0.0)

    out = (wy0 * wx0 * sample(iy0, ix0) + wy0 * wx1 * sample(iy0, ix1) +
           wy1 * wx0 * sample(iy1, ix0) + wy1 * wx1 * sample(iy1, ix1))
    return out.astype(np.float32)


if __name__ == "__main__":
    B, C, H, W = 2, 4, 16, 16
    key = jax.random.PRNGKey(0)
    x = jax.random.normal(key, (B, C, H, W), dtype=jnp.float32)

    affine = build_affine_2d(seed=0)          # deterministic "randomize()"

    out = jax.block_until_ready(random_affine_forward(x, affine))
    ref = reference_forward(np.asarray(x), affine)

    # x and the sampling weights are bf16 at the matmul (f32 accumulation)
    # -> ~1e-2 absolute error bound vs the f64/explicit-gather reference.
    np.testing.assert_allclose(np.asarray(out), ref, atol=5e-2, rtol=5e-2)

    print("KERNEL_OK")
</pallas_src>

<mosaic_0001>
module attributes {stable_mosaic.version = 11 : i64} {
  func.func @affine_sample_kernel(%arg0: i32, %arg1: i32, %arg2: memref<2xi32, #tpu.memory_space<smem>>, %arg3: memref<8x128xi32, #tpu.memory_space<vmem>>, %arg4: memref<8x128xf32, #tpu.memory_space<vmem>>, %arg5: memref<16x256xbf16, #tpu.memory_space<any>>, %arg6: memref<16x128xf32, #tpu.memory_space<vmem>>, %arg7: memref<16x256xbf16, #tpu.memory_space<vmem>>, %arg8: memref<1x!tpu.dma_semaphore, #tpu.memory_space<semaphore_mem>>) attributes {dimension_semantics = [#tpu.dimension_semantics<parallel>, #tpu.dimension_semantics<parallel>], iteration_bounds = array<i64: 1, 2>, scalar_prefetch = 1 : i64, scratch_operands = 2 : i64, tpu.core_type = #tpu.core_type<tc>, window_params = [{transform_indices = @transform_0, window_bounds = array<i64: 8, 128>}, {transform_indices = @transform_1, window_bounds = array<i64: 8, 128>}, {}, {transform_indices = @transform_3, window_bounds = array<i64: 16, 128>}]} {
    %0 = arith.index_cast %arg1 : i32 to index
    %1 = memref.load %arg2[%0] : memref<2xi32, #tpu.memory_space<smem>>
    %2 = tpu.assume_multiple %1, 128 : i32
    %c16_i32 = arith.constant 16 : i32
    %3 = arith.muli %arg0, %c16_i32 : i32
    %4 = tpu.assume_multiple %3, 16 : i32
    %c0_i32 = arith.constant 0 : i32
    %5 = tpu.memref_slice %arg5[%4, %2] : memref<16x256xbf16, #tpu.memory_space<any>> -> memref<16x256xbf16, #tpu.memory_space<any>>
    %6 = tpu.memref_slice %arg8[%c0_i32] : memref<1x!tpu.dma_semaphore, #tpu.memory_space<semaphore_mem>> -> memref<1x!tpu.dma_semaphore, #tpu.memory_space<semaphore_mem>>
    %7 = tpu.memref_squeeze %6 : memref<1x!tpu.dma_semaphore, #tpu.memory_space<semaphore_mem>> -> memref<!tpu.dma_semaphore, #tpu.memory_space<semaphore_mem>>
    tpu.enqueue_dma source(%5 : memref<16x256xbf16, #tpu.memory_space<any>>) target(%arg7 : memref<16x256xbf16, #tpu.memory_space<vmem>>) target_semaphore(%7 : memref<!tpu.dma_semaphore, #tpu.memory_space<semaphore_mem>>)
    %c0 = arith.constant 0 : index
    %c0_0 = arith.constant 0 : index
    %8 = vector.load %arg3[%c0, %c0_0] : memref<8x128xi32, #tpu.memory_space<vmem>>, vector<8x128xi32>
    %c0_1 = arith.constant 0 : index
    %c0_2 = arith.constant 0 : index
    %9 = vector.load %arg4[%c0_1, %c0_2] : memref<8x128xf32, #tpu.memory_space<vmem>>, vector<8x128xf32>
    %10 = tpu.iota {dimensions = array<i32: 0>} : vector<256x128xi32>
    %11 = vector.extract_strided_slice %8 {offsets = [0, 0], sizes = [1, 128], strides = [1, 1]} : vector<8x128xi32> to vector<1x128xi32>
    %12 = vector.broadcast %11 : vector<1x128xi32> to vector<256x128xi32>
    %13 = arith.cmpi eq, %10, %12 : vector<256x128xi32>
    %14 = vector.extract_strided_slice %9 {offsets = [0, 0], sizes = [1, 128], strides = [1, 1]} : vector<8x128xf32> to vector<1x128xf32>
    %cst = arith.constant 0.000000e+00 : f32
    %15 = vector.shape_cast %14 : vector<1x128xf32> to vector<1x128xf32>
    %16 = vector.broadcast %15 : vector<1x128xf32> to vector<256x128xf32>
    %17 = vector.broadcast %cst : f32 to vector<256x128xf32>
    %18 = arith.select %13, %16, %17 : vector<256x128xi1>, vector<256x128xf32>
    %19 = vector.extract_strided_slice %8 {offsets = [1, 0], sizes = [1, 128], strides = [1, 1]} : vector<8x128xi32> to vector<1x128xi32>
    %20 = vector.broadcast %19 : vector<1x128xi32> to vector<256x128xi32>
    %21 = arith.cmpi eq, %10, %20 : vector<256x128xi32>
    %22 = vector.extract_strided_slice %9 {offsets = [1, 0], sizes = [1, 128], strides = [1, 1]} : vector<8x128xf32> to vector<1x128xf32>
    %23 = vector.shape_cast %22 : vector<1x128xf32> to vector<1x128xf32>
    %24 = vector.broadcast %23 : vector<1x128xf32> to vector<256x128xf32>
    %25 = arith.select %21, %24, %18 : vector<256x128xi1>, vector<256x128xf32>
    %26 = vector.extract_strided_slice %8 {offsets = [2, 0], sizes = [1, 128], strides = [1, 1]} : vector<8x128xi32> to vector<1x128xi32>
    %27 = vector.broadcast %26 : vector<1x128xi32> to vector<256x128xi32>
    %28 = arith.cmpi eq, %10, %27 : vector<256x128xi32>
    %29 = vector.extract_strided_slice %9 {offsets = [2, 0], sizes = [1, 128], strides = [1, 1]} : vector<8x128xf32> to vector<1x128xf32>
    %30 = vector.shape_cast %29 : vector<1x128xf32> to vector<1x128xf32>
    %31 = vector.broadcast %30 : vector<1x128xf32> to vector<256x128xf32>
    %32 = arith.select %28, %31, %25 : vector<256x128xi1>, vector<256x128xf32>
    %33 = vector.extract_strided_slice %8 {offsets = [3, 0], sizes = [1, 128], strides = [1, 1]} : vector<8x128xi32> to vector<1x128xi32>
    %34 = vector.broadcast %33 : vector<1x128xi32> to vector<256x128xi32>
    %35 = arith.cmpi eq, %10, %34 : vector<256x128xi32>
    %36 = vector.extract_strided_slice %9 {offsets = [3, 0], sizes = [1, 128], strides = [1, 1]} : vector<8x128xf32> to vector<1x128xf32>
    %37 = vector.shape_cast %36 : vector<1x128xf32> to vector<1x128xf32>
    %38 = vector.broadcast %37 : vector<1x128xf32> to vector<256x128xf32>
    %39 = arith.select %35, %38, %32 : vector<256x128xi1>, vector<256x128xf32>
    %40 = arith.truncf %39 : vector<256x128xf32> to vector<256x128xbf16>
    %c0_i32_3 = arith.constant 0 : i32
    %41 = tpu.memref_slice %arg5[%4, %2] : memref<16x256xbf16, #tpu.memory_space<any>> -> memref<16x256xbf16, #tpu.memory_space<any>>
    %42 = tpu.memref_slice %arg8[%c0_i32_3] : memref<1x!tpu.dma_semaphore, #tpu.memory_space<semaphore_mem>> -> memref<1x!tpu.dma_semaphore, #tpu.memory_space<semaphore_mem>>
    %43 = tpu.memref_squeeze %42 : memref<1x!tpu.dma_semaphore, #tpu.memory_space<semaphore_mem>> -> memref<!tpu.dma_semaphore, #tpu.memory_space<semaphore_mem>>
    tpu.wait_dma2 semaphore(%43 : memref<!tpu.dma_semaphore, #tpu.memory_space<semaphore_mem>>) src(%41 : memref<16x256xbf16, #tpu.memory_space<any>>) dst(%arg7 : memref<16x256xbf16, #tpu.memory_space<vmem>>)
    %c0_4 = arith.constant 0 : index
    %c0_5 = arith.constant 0 : index
    %44 = vector.load %arg7[%c0_4, %c0_5] : memref<16x256xbf16, #tpu.memory_space<vmem>>, vector<16x256xbf16>
    %cst_6 = arith.constant dense<0.000000e+00> : vector<16x128xf32>
    %45 = tpu.matmul %44, %40, %cst_6 {dimension_numbers = #tpu.dot_dimension_numbers<[1], [0], [0], [1], [0, 0, 1, 1], [], []>} : vector<16x256xbf16>, vector<256x128xbf16>, vector<16x128xf32> -> vector<16x128xf32>
    %c0_7 = arith.constant 0 : index
    %c0_8 = arith.constant 0 : index
    %46 = vector.load %arg6[%c0_7, %c0_8] : memref<16x128xf32, #tpu.memory_space<vmem>>, vector<16x128xf32>
    tpu.vector_store %arg6[%c0_7, %c0_8], %45 {strides = array<i32>} : memref<16x128xf32, #tpu.memory_space<vmem>>, vector<16x128xf32>,
    return
  }
  func.func @transform_0(%arg0: i32, %arg1: i32, %arg2: memref<2xi32, #tpu.memory_space<smem>>) -> (i32, i32) {
    %c0_i32 = arith.constant 0 : i32
    %c0_i32_0 = arith.constant 0 : i32
    return %c0_i32, %arg1 : i32, i32
  }
  func.func @transform_1(%arg0: i32, %arg1: i32, %arg2: memref<2xi32, #tpu.memory_space<smem>>) -> (i32, i32) {
    %c0_i32 = arith.constant 0 : i32
    %c0_i32_0 = arith.constant 0 : i32
    return %c0_i32, %arg1 : i32, i32
  }
  func.func @transform_3(%arg0: i32, %arg1: i32, %arg2: memref<2xi32, #tpu.memory_space<smem>>) -> (i32, i32) {
    %c0_i32 = arith.constant 0 : i32
    return %arg0, %arg1 : i32, i32
  }
}

</mosaic_0001>

<bundles_post_ra>
// kernel: tpu_custom_call.1
= control target key start
LH: loop header
LB: loop body
LE: loop exit
PB: predicated region body
PF: predicated region fallthrough
CT: control target
= control target key end

     0   :  { %s1062_s15 = smov [#allocation5]   ;;  %s2487_s0 = inlined_call_operand.hbm [shape: s32[2], index: 0, kind: input, shape index: {}]   ;;  %s2488_s1 = inlined_call_operand.hbm [shape: s32[8,256], index: 1, kind: input, shape index: {}]   ;;  %s2489_s2 = inlined_call_operand.hbm [shape: f32[8,256], index: 2, kind: input, shape index: {}]   ;;  %s2490_s3 = inlined_call_operand.hbm [shape: bf16[16,256], index: 3, kind: input, shape index: {}]   ;;  %s2491_s4 = inlined_call_operand.hbm [shape: f32[16,256], index: 4, kind: output, shape index: {}]  }
   0x1   :  { %10 = dma.hbm_to_smem %s2487_s0, 16, %s1062_s15, [#allocation4] }
   0x2   :  { %1022 = dma.done.wait [#allocation4], 16 }
   0x3   :  { %1023 = vsyncadd [#allocation4], 4294967280 }
   0x4   :  { %12 = sfence }
   0x5   :  { %13 = vsyncpa [#allocation7], 0 }
   0x6   :  { %15 = vsyncpa [#allocation7 + $0x1], 0 }
   0x7   :  { %16 = vsyncpa [#allocation10], 0 }
   0x8   :  { %18 = vsyncpa [#allocation10 + $0x1], 0 }
   0x9   :  { %19 = vsyncpa [#allocation8], 0 }
   0xa   :  { %21 = vsyncpa [#allocation8 + $0x1], 0  ;;  %s1098_s18 = smov 0   ;;  %s1100_s19 = smov 0  }
   0xb   :  { %s1102_s20 = smov 0   ;;  %s1104_s21 = smov 0  }
   0xc   :  { %s1106_s22 = smov 0   ;;  %s1108_s0 = smov 0  }
   0xd LB: > { %s769_s23 = sadd.s32 4294967295, %s1060_s0   ;;  %s770_s24 = sadd.s32 4294967294, %s1060_s0   ;;  %s1060_s0 = sphi %s1108_s0, %s27_s0   ;;  %s1056_s22 = sphi %s1106_s22, %s2615_s22   ;;  %s1052_s21 = sphi %s1104_s21, %s2614_s21   ;;  %s1048_s20 = sphi %s1102_s20, %s2613_s20   ;;  %s1044_s19 = sphi %s1100_s19, %s2612_s19   ;;  %s1040_s18 = sphi %s1098_s18, %s2611_s18  }
   0xe   : > { %s36_s25 = sadd.s32 1, %s1056_s22  ;;  %s46_s26 = sadd.s32 1, %s1048_s20 }
   0xf   : > { %p37_p0 = scmp.ge.s32.totalorder %s36_s25, 2  ;;  %p53_p1 = scmp.ne.s32.totalorder %s1048_s20, %s1044_s19 }
  0x10   : > { %p54_p2 = scmp.eq.s32.totalorder %s1060_s0, 0  ;;  %p59_p3 = scmp.ne.s32.totalorder %s1044_s19, %s1040_s18 }
  0x11   : > { %s2617_s25 = smov (%p37_p0, %s36_s25), 0  ;;  %p60_p5 = scmp.eq.s32.totalorder %s769_s23, 0 }
  0x12   : > { %p1139_p4 = por %p54_p2, %p53_p1  ;;  %s43_s28 = ssub.s32 %s1056_s22, %s2617_s25 }
  0x13   : > { %p111_p6 = scmp.eq.s32.totalorder %s769_s23, 1  ;;  %p44_p7 = scmp.eq.s32.totalorder %s43_s28, 0 }
  0x14   : > { %p1145_p8 = por %p60_p5, %p59_p3  ;;  %p117_p10 = scmp.eq.s32.totalorder %s770_s24, 1 }
  0x15   : > { %p1149_p9 = por %p111_p6, %p53_p1  ;;  %p828_p13 = scmp.lt.s32.totalorder %s1060_s0, 2 }
  0x16   : > { %s1154_s5 = scalar_select %p44_p7, %s1048_s20, %s46_s26  }
  0x17   : > { %p1156_p11 = por %p117_p10, %p59_p3  ;;  %s1163_s7 = sand.u32 1, %s1048_s20  }
  0x18   : > { %s773_s8 = sshll.u32 %s1163_s7, 3  ;;  %s774_s9 = sshll.u32 %s1056_s22, 7 }
  0x19   : > { %s146_s12 = scalar_lea.hbm %s2488_s1, %s774_s9  ;;  %s141_s13 = scalar_lea.vmem [#allocation6], %s773_s8 }
  0x1a   : > { %s148_s14 = sshll.u32 %s141_s13, 4  ;;  %p1172_p0 = pnand %p828_p13, %p1139_p4  ;;  %s149_s14 = int_to_ptr.vmem [resolvable:$true] %s148_s14 }
  0x1b   : > { %p777_p1 = scmp.ge.s32.totalorder %s1060_s0, 1  ;;  %p171_p2 = scmp.lt.s32.totalorder %s1060_s0, 3 }
  0x1c   : > { %s138_s16 = scalar_lea.sflag [#allocation7], %s1163_s7  ;;  %p896_p3 = pneg %p1172_p0 }
  0x1d   : > { %s907_s17 = scalar_lea.vmem %s149_s14, 128  ;;  %s1063_s23 = smov [#allocation6]  }
  0x1e   : > { %p908_p5 = scmp.ne.s32.totalorder %s149_s14, %s907_s17  ;;  %s912_s24 = sshll.u32 %s1063_s23, 4  ;;  %s913_s24 = int_to_ptr.vmem [resolvable:$false] %s912_s24 }
  0x1f   : > { %s914_s26 = scalar_lea.vmem %s913_s24, 256  ;;  %p915_p4 = scmp.lt.s32.totalorder %s149_s14, %s913_s24 }
  0x20   : > { %p910_p6 = pnand %p908_p5, %p896_p3  ;;  %p916_p10 = scmp.lt.s32.totalorder %s914_s26, %s907_s17 }
  0x22   : > { %p911_p7 = pneg %p910_p6  ;;  %p917_p13 = por %p916_p10, %p915_p4 }
  0x24   : > { %p918_p12 = pnand %p917_p13, %p911_p7 }
  0x26   : > { %921 = shalt.err (!%p918_p12)
}
  0x27   : > { %820 = dma.hbm_to_vmem [thread:$0]  (!%p1172_p0), %s146_s12, 128, %s149_s14, %s138_s16  }
  0x28   : > { %p1190_p5 = pnand %p777_p1, %p171_p2  ;;  %s164_s11 = scalar_lea.hbm %s2489_s2, %s774_s9 }
  0x29   : > { %s159_s13 = scalar_lea.vmem [#allocation9], %s773_s8  ;;  %s156_s23 = scalar_lea.sflag [#allocation10], %s1163_s7 }
  0x2a   : > { %s166_s17 = sshll.u32 %s159_s13, 4  ;;  %s1064_s12 = smov [#allocation9]   ;;  %s167_s17 = int_to_ptr.vmem [resolvable:$true] %s166_s17 }
  0x2b   : > { %s935_s24 = scalar_lea.vmem %s167_s17, 128  ;;  %s940_s14 = sshll.u32 %s1064_s12, 4  ;;  %s941_s14 = int_to_ptr.vmem [resolvable:$false] %s940_s14 }
  0x2c   : > { %p936_p12 = scmp.ne.s32.totalorder %s167_s17, %s935_s24  ;;  %s942_s16 = scalar_lea.vmem %s941_s14, 256 }
  0x2d   : > { %p943_p1 = scmp.lt.s32.totalorder %s167_s17, %s941_s14  ;;  %p944_p2 = scmp.lt.s32.totalorder %s942_s16, %s935_s24 }
  0x2e   : > { %p938_p6 = pnand %p936_p12, %p896_p3 }
  0x2f   : > { %p945_p4 = por %p944_p2, %p943_p1 }
  0x30   : > { %p939_p7 = pneg %p938_p6 }
  0x32   : > { %p946_p10 = pnand %p945_p4, %p939_p7 }
  0x34   : > { %949 = shalt.err (!%p946_p10)
}
  0x35   : > { %823 = dma.hbm_to_vmem [thread:$0]  (!%p1172_p0), %s164_s11, 128, %s167_s17, %s156_s23  }
  0x36   : > { %175 = sbr.rel (%p1190_p5) target bundleno = 417 (0x1a1), region = 28 }
  0x3b   : > { %s1206_s7 = sand.u32 1, %s1044_s19  }
  0x3c   : > { %s778_s8 = sshll.u32 %s1206_s7, 3  ;;  %s178_s9 = scalar_lea.sflag [#allocation7], %s1206_s7 }
  0x3d   : > { %s1210_s26 = scalar_lea.vmem [#allocation6], %s778_s8 }
  0x3e   : > { %1025 = dma.done.wait (%p1145_p8), %s178_s9, 128  }
  0x3f   : > { %1027 = vsyncadd (%p1145_p8), %s178_s9, 4294967168  ;;  %s187_s15 = scalar_lea.sflag [#allocation10], %s1206_s7  ;;  %s1217_s27 = scalar_lea.vmem [#allocation9], %s778_s8 }
  0x40   : > { %1029 = dma.done.wait (%p1145_p8), %s187_s15, 128  }
  0x41   : > { %1031 = vsyncadd (%p1145_p8), %s187_s15, 4294967168  ;;  %s780_s28 = sshll.u32 %s1206_s7, 4  ;;  %v241_v0 = vlaneseq  ;;  %s218_s10 = sld [smem:[#allocation5 + %s1052_s21]] }
  0x42   : > { %s1065_s11 = smov [#allocation2]   ;;  %s952_s9 = scalar_lea.hbm %s2490_s3, 256 }
  0x43   : > { %v1225_v1 = vshrl.u32 %v241_v0, 7  ;;  %s235_s13 = sshll.u32 %s1065_s11, 4  ;;  %s1248_s13 = int_to_ptr.vmem [resolvable:$true] %s235_s13 }
  0x45   : > { %v1228_v2 = vadd.s32 8, %v1225_v1  ;;  %v1231_v3 = vadd.s32 16, %v1225_v1  ;;  %v1234_v4 = vadd.s32 24, %v1225_v1  ;;  %v1237_v5 = vadd.s32 32, %v1225_v1 }
  0x46   : > { %v1240_v6 = vadd.s32 40, %v1225_v1  ;;  %v1243_v7 = vadd.s32 48, %v1225_v1  ;;  %v1246_v8 = vadd.s32 56, %v1225_v1  ;;  %v1251_v9 = vadd.s32 64, %v1225_v1 }
  0x47   : > { %s220_s29 = sshra.s32 %s218_s10, 7  ;;  %v1254_v10 = vadd.s32 72, %v1225_v1  ;;  %v1257_v11 = vadd.s32 80, %v1225_v1  ;;  %v1260_v12 = vadd.s32 88, %v1225_v1  ;;  %v1263_v13 = vadd.s32 96, %v1225_v1 }
  0x48   : > { %s781_s17 = sshll.u32 %s220_s29, 6  ;;  %v1266_v14 = vadd.s32 104, %v1225_v1  ;;  %v1269_v15 = vadd.s32 112, %v1225_v1  ;;  %v1272_v16 = vadd.s32 120, %v1225_v1  ;;  %v1278_v17 = vadd.s32 128, %v1225_v1 }
  0x49   : > { %s227_s12 = scalar_lea.hbm %s2490_s3, %s781_s17  ;;  %v1281_v18 = vadd.s32 136, %v1225_v1  ;;  %v1284_v19 = vadd.s32 144, %v1225_v1  ;;  %v1287_v20 = vadd.s32 152, %v1225_v1 }
  0x4a   : > { %s950_s14 = scalar_lea.hbm %s227_s12, 256  ;;  %p953_p0 = scmp.lt.s32.totalorder %s227_s12, %s2490_s3 }
  0x4b   : > { %p951_p8 = scmp.ne.s32.totalorder %s227_s12, %s950_s14  ;;  %p954_p3 = scmp.lt.s32.totalorder %s952_s9, %s950_s14 }
  0x4d   : > { %p955_p13 = por %p954_p3, %p953_p0 }
  0x4f   : > { %p956_p5 = pnand %p955_p13, %p951_p8 }
  0x51   : > { %959 = shalt.err (!%p956_p5)  }
  0x52   : > { %s960_s11 = scalar_lea.vmem %s1248_s13, 256  ;;  %p965_p6 = scmp.lt.s32.totalorder %s1248_s13, %s1248_s13 }
  0x53   : > { %p961_p12 = scmp.ne.s32.totalorder %s1248_s13, %s960_s11  ;;  %p966_p7 = scmp.lt.s32.totalorder %s960_s11, %s960_s11 }
  0x55   : > { %p967_p1 = por %p966_p7, %p965_p6 }
  0x57   : > { %p968_p2 = pnand %p967_p1, %p961_p12 }
  0x59   : > { %971 = shalt.err (!%p968_p2)  }
  0x5a   : > { %238 = dma.hbm_to_vmem [thread:$0]  %s227_s12, 256, %s1248_s13, [#allocation3]  ;;  %v1301_v21 = vadd.s32 160, %v1225_v1  ;;  %v1304_v22 = vadd.s32 168, %v1225_v1  ;;  %v1307_v23 = vadd.s32 176, %v1225_v1  ;;  %v1310_v24 = vadd.s32 184, %v1225_v1 }
  0x5b   : > { %v239_v25 = vld [vmem:[%s1210_s26] sm:$0xff]  ;;  %v240_v26 = vld [vmem:[%s1217_s27] sm:$0xff]  ;;  %v1315_v27 = vadd.s32 192, %v1225_v1  ;;  %v1318_v28 = vadd.s32 200, %v1225_v1  ;;  %v1321_v29 = vadd.s32 208, %v1225_v1  ;;  %v1324_v30 = vadd.s32 216, %v1225_v1 }
  0x5c   : > { %v276_v31 = vsub.s32 0, %v1225_v1  ;;  %v348_v32 = vsub.s32 1, %v1225_v1  ;;  %v420_v33 = vsub.s32 2, %v1225_v1  ;;  %v492_v34 = vsub.s32 3, %v1225_v1  ;;  %s2428_s26 = scalar_lea.vmem [#allocation11], %s780_s28 }
  0x5d   : > { %v1331_v35 = vadd.s32 224, %v1225_v1  ;;  %v1334_v36 = vadd.s32 232, %v1225_v1  ;;  %v1337_v37 = vadd.s32 240, %v1225_v1  ;;  %v1340_v38 = vadd.s32 248, %v1225_v1 }
  0x5e   : > { %v1342_v39 = vrot.slane %v239_v25, %v276_v31  ;;  %v1344_v40 = vrot.slane %v240_v26, %v276_v31  ;;  %v1346_v41 = vrot.slane %v239_v25, %v348_v32  ;;  %v1348_v42 = vrot.slane %v240_v26, %v348_v32 }
  0x5f   : > { %2504 = vst [vmem:[#allocation21_spill] sm:$0xff] %v1340_v38  ;;  %v1350_v43 = vrot.slane %v239_v25, %v420_v33  ;;  %v1352_v44 = vrot.slane %v240_v26, %v420_v33  ;;  %v1354_v45 = vrot.slane %v239_v25, %v492_v34  ;;  %v1356_v46 = vrot.slane %v240_v26, %v492_v34 }
  0x60   : > { %vm278_vm0 = vcmp.eq.s32.totalorder %v1225_v1, %v1342_v39  ;;  %vm279_vm1 = vcmp.eq.s32.totalorder %v1228_v2, %v1342_v39  ;;  %vm280_vm2 = vcmp.eq.s32.totalorder %v1231_v3, %v1342_v39  ;;  %vm281_vm3 = vcmp.eq.s32.totalorder %v1234_v4, %v1342_v39 }
  0x61   : > { %2505 = vst [vmem:[#allocation22_spill] sm:$0xff] %v1350_v43  ;;  %2506 = vst [vmem:[#allocation23_spill] sm:$0xff] %v1352_v44  ;;  %vm282_vm4 = vcmp.eq.s32.totalorder %v1237_v5, %v1342_v39  ;;  %vm283_vm5 = vcmp.eq.s32.totalorder %v1240_v6, %v1342_v39  ;;  %vm284_vm6 = vcmp.eq.s32.totalorder %v1243_v7, %v1342_v39  ;;  %v1426_v47 = vsel %vm278_vm0, %v1344_v40, 0.0 }
  0x62   : > { %2507 = vst [vmem:[#allocation24_spill] sm:$0xff] %v1354_v45  ;;  %2508 = vst [vmem:[#allocation25_spill] sm:$0xff] %v1356_v46  ;;  %vm285_vm7 = vcmp.eq.s32.totalorder %v1246_v8, %v1342_v39  ;;  %vm286_vm8 = vcmp.eq.s32.totalorder %v1251_v9, %v1342_v39  ;;  %vm303_vm11 = vcmp.eq.s32.totalorder %v1318_v28, %v1342_v39  ;;  %v1432_v48 = vsel %vm279_vm1, %v1344_v40, 0.0 }
  0x63   : > { %vm304_vm12 = vcmp.eq.s32.totalorder %v1321_v29, %v1342_v39  ;;  %vm305_vm13 = vcmp.eq.s32.totalorder %v1324_v30, %v1342_v39  ;;  %vm306_vm14 = vcmp.eq.s32.totalorder %v1331_v35, %v1342_v39  ;;  %vm307_vm15 = vcmp.eq.s32.totalorder %v1334_v36, %v1342_v39 }
  0x64   : > { %vm308_vm9 = vcmp.eq.s32.totalorder %v1337_v37, %v1342_v39  ;;  %vm309_vm10 = vcmp.eq.s32.totalorder %v1340_v38, %v1342_v39  ;;  %v1438_v49 = vsel %vm280_vm2, %v1344_v40, 0.0  ;;  %v1444_v50 = vsel %vm281_vm3, %v1344_v40, 0.0 }
  0x65   : > { %v1450_v51 = vsel %vm282_vm4, %v1344_v40, 0.0  ;;  %v1456_v52 = vsel %vm283_vm5, %v1344_v40, 0.0  ;;  %v1462_v53 = vsel %vm284_vm6, %v1344_v40, 0.0  ;;  %v1468_v54 = vsel %vm285_vm7, %v1344_v40, 0.0 }
  0x66   : > { %v1474_v55 = vsel %vm286_vm8, %v1344_v40, 0.0  ;;  %vm2509_vm0 = vcmp.eq.s32.totalorder %v1254_v10, %v1342_v39  ;;  %vm2510_vm1 = vcmp.eq.s32.totalorder %v1257_v11, %v1342_v39  ;;  %vm2511_vm2 = vcmp.eq.s32.totalorder %v1260_v12, %v1342_v39 }
  0x67   : > { %v1480_v56 = vsel %vm2509_vm0, %v1344_v40, 0.0  ;;  %v1486_v57 = vsel %vm2510_vm1, %v1344_v40, 0.0  ;;  %v1492_v58 = vsel %vm2511_vm2, %v1344_v40, 0.0  ;;  %vm2512_vm3 = vcmp.eq.s32.totalorder %v1263_v13, %v1342_v39 }
  0x68   : > { %v1498_v59 = vsel %vm2512_vm3, %v1344_v40, 0.0  ;;  %vm2513_vm4 = vcmp.eq.s32.totalorder %v1266_v14, %v1342_v39  ;;  %vm2514_vm5 = vcmp.eq.s32.totalorder %v1269_v15, %v1342_v39  ;;  %vm2515_vm6 = vcmp.eq.s32.totalorder %v1272_v16, %v1342_v39 }
  0x69   : > { %v1504_v60 = vsel %vm2513_vm4, %v1344_v40, 0.0  ;;  %v1510_v61 = vsel %vm2514_vm5, %v1344_v40, 0.0  ;;  %v1516_v62 = vsel %vm2515_vm6, %v1344_v40, 0.0  ;;  %vm2516_vm7 = vcmp.eq.s32.totalorder %v1278_v17, %v1342_v39 }
  0x6a   : > { %v1522_v63 = vsel %vm2516_vm7, %v1344_v40, 0.0  ;;  %vm2517_vm8 = vcmp.eq.s32.totalorder %v1281_v18, %v1342_v39  ;;  %vm2518_vm0 = vcmp.eq.s32.totalorder %v1284_v19, %v1342_v39  ;;  %vm2519_vm1 = vcmp.eq.s32.totalorder %v1287_v20, %v1342_v39 }
  0x6b   : > { %v1528_v0 = vsel %vm2517_vm8, %v1344_v40, 0.0  ;;  %v1534_v25 = vsel %vm2518_vm0, %v1344_v40, 0.0  ;;  %v1540_v26 = vsel %vm2519_vm1, %v1344_v40, 0.0  ;;  %vm2520_vm2 = vcmp.eq.s32.totalorder %v1301_v21, %v1342_v39 }
  0x6c   : > { %v1546_v31 = vsel %vm2520_vm2, %v1344_v40, 0.0  ;;  %vm2521_vm3 = vcmp.eq.s32.totalorder %v1304_v22, %v1342_v39  ;;  %vm2522_vm4 = vcmp.eq.s32.totalorder %v1307_v23, %v1342_v39  ;;  %vm2523_vm5 = vcmp.eq.s32.totalorder %v1310_v24, %v1342_v39 }
  0x6d   : > { %v1552_v32 = vsel %vm2521_vm3, %v1344_v40, 0.0  ;;  %v1558_v33 = vsel %vm2522_vm4, %v1344_v40, 0.0  ;;  %v1564_v34 = vsel %vm2523_vm5, %v1344_v40, 0.0  ;;  %vm2524_vm6 = vcmp.eq.s32.totalorder %v1315_v27, %v1342_v39 }
  0x6e   : > { %v1570_v46 = vsel %vm2524_vm6, %v1344_v40, 0.0  ;;  %v1576_v45 = vsel %vm303_vm11, %v1344_v40, 0.0  ;;  %v1582_v44 = vsel %vm304_vm12, %v1344_v40, 0.0  ;;  %v1588_v43 = vsel %vm305_vm13, %v1344_v40, 0.0 }
  0x6f   : > { %2525 = vst [vmem:[#allocation26_spill] sm:$0xff] %v1570_v46  ;;  %2526 = vst [vmem:[#allocation27_spill] sm:$0xff] %v1576_v45  ;;  %v1594_v46 = vsel %vm306_vm14, %v1344_v40, 0.0  ;;  %v1600_v45 = vsel %vm307_vm15, %v1344_v40, 0.0  ;;  %vm350_vm11 = vcmp.eq.s32.totalorder %v1225_v1, %v1346_v41  ;;  %vm351_vm12 = vcmp.eq.s32.totalorder %v1228_v2, %v1346_v41 }
  0x70   : > { %2527 = vst [vmem:[#allocation28_spill] sm:$0xff] %v1582_v44  ;;  %2528 = vst [vmem:[#allocation29_spill] sm:$0xff] %v1588_v43  ;;  %v1606_v44 = vsel %vm308_vm9, %v1344_v40, 0.0  ;;  %v1612_v43 = vsel %vm309_vm10, %v1344_v40, 0.0  ;;  %vm352_vm13 = vcmp.eq.s32.totalorder %v1231_v3, %v1346_v41  ;;  %vm353_vm14 = vcmp.eq.s32.totalorder %v1234_v4, %v1346_v41 }
  0x71   : > { %vm354_vm9 = vcmp.eq.s32.totalorder %v1237_v5, %v1346_v41  ;;  %vm355_vm15 = vcmp.eq.s32.totalorder %v1240_v6, %v1346_v41  ;;  %vm356_vm10 = vcmp.eq.s32.totalorder %v1243_v7, %v1346_v41  ;;  %vm357_vm7 = vcmp.eq.s32.totalorder %v1246_v8, %v1346_v41 }
  0x72   : > { %vm358_vm8 = vcmp.eq.s32.totalorder %v1251_v9, %v1346_v41  ;;  %vm375_vm2 = vcmp.eq.s32.totalorder %v1318_v28, %v1346_v41  ;;  %vm376_vm3 = vcmp.eq.s32.totalorder %v1321_v29, %v1346_v41  ;;  %vm377_vm4 = vcmp.eq.s32.totalorder %v1324_v30, %v1346_v41 }
  0x73   : > { %vm378_vm5 = vcmp.eq.s32.totalorder %v1331_v35, %v1346_v41  ;;  %vm379_vm6 = vcmp.eq.s32.totalorder %v1334_v36, %v1346_v41  ;;  %vm380_vm0 = vcmp.eq.s32.totalorder %v1337_v37, %v1346_v41  ;;  %vm381_vm1 = vcmp.eq.s32.totalorder %v1340_v38, %v1346_v41 }
  0x74   : > { %v1683_v39 = vsel %vm350_vm11, %v1348_v42, %v1426_v47  ;;  %v1690_v40 = vsel %vm351_vm12, %v1348_v42, %v1432_v48  ;;  %v1697_v38 = vsel %vm352_vm13, %v1348_v42, %v1438_v49  ;;  %v1704_v47 = vsel %vm353_vm14, %v1348_v42, %v1444_v50 }
  0x75   : > { %v1711_v48 = vsel %vm354_vm9, %v1348_v42, %v1450_v51  ;;  %v1718_v49 = vsel %vm355_vm15, %v1348_v42, %v1456_v52  ;;  %v1725_v50 = vsel %vm356_vm10, %v1348_v42, %v1462_v53  ;;  %v1732_v51 = vsel %vm357_vm7, %v1348_v42, %v1468_v54 }
  0x76   : > { %v1739_v52 = vsel %vm358_vm8, %v1348_v42, %v1474_v55  ;;  %vm2529_vm11 = vcmp.eq.s32.totalorder %v1254_v10, %v1346_v41  ;;  %vm2530_vm12 = vcmp.eq.s32.totalorder %v1257_v11, %v1346_v41  ;;  %vm2531_vm13 = vcmp.eq.s32.totalorder %v1260_v12, %v1346_v41 }
  0x77   : > { %v1746_v53 = vsel %vm2529_vm11, %v1348_v42, %v1480_v56  ;;  %v1753_v54 = vsel %vm2530_vm12, %v1348_v42, %v1486_v57  ;;  %v1760_v55 = vsel %vm2531_vm13, %v1348_v42, %v1492_v58  ;;  %vm2532_vm14 = vcmp.eq.s32.totalorder %v1263_v13, %v1346_v41 }
  0x78   : > { %v1767_v56 = vsel %vm2532_vm14, %v1348_v42, %v1498_v59  ;;  %vm2533_vm9 = vcmp.eq.s32.totalorder %v1266_v14, %v1346_v41  ;;  %vm2534_vm15 = vcmp.eq.s32.totalorder %v1269_v15, %v1346_v41  ;;  %vm2535_vm10 = vcmp.eq.s32.totalorder %v1272_v16, %v1346_v41 }
  0x79   : > { %v1774_v57 = vsel %vm2533_vm9, %v1348_v42, %v1504_v60  ;;  %v1781_v58 = vsel %vm2534_vm15, %v1348_v42, %v1510_v61  ;;  %v1788_v59 = vsel %vm2535_vm10, %v1348_v42, %v1516_v62  ;;  %vm2536_vm7 = vcmp.eq.s32.totalorder %v1278_v17, %v1346_v41 }
  0x7a   : > { %v1795_v60 = vsel %vm2536_vm7, %v1348_v42, %v1522_v63  ;;  %vm2537_vm8 = vcmp.eq.s32.totalorder %v1281_v18, %v1346_v41  ;;  %vm2538_vm11 = vcmp.eq.s32.totalorder %v1284_v19, %v1346_v41  ;;  %vm2539_vm12 = vcmp.eq.s32.totalorder %v1287_v20, %v1346_v41 }
  0x7b   : > { %v1802_v61 = vsel %vm2537_vm8, %v1348_v42, %v1528_v0  ;;  %v1809_v62 = vsel %vm2538_vm11, %v1348_v42, %v1534_v25  ;;  %v1816_v63 = vsel %vm2539_vm12, %v1348_v42, %v1540_v26  ;;  %vm2540_vm13 = vcmp.eq.s32.totalorder %v1301_v21, %v1346_v41 }
  0x7c   : > { %v1823_v0 = vsel %vm2540_vm13, %v1348_v42, %v1546_v31  ;;  %vm2542_vm14 = vcmp.eq.s32.totalorder %v1304_v22, %v1346_v41  ;;  %vm2544_vm9 = vcmp.eq.s32.totalorder %v1307_v23, %v1346_v41  ;;  %vm2546_vm15 = vcmp.eq.s32.totalorder %v1310_v24, %v1346_v41 }
  0x7d   : > { %2541 = vst [vmem:[#allocation30_spill] sm:$0xff] %v1823_v0  ;;  %v1830_v25 = vsel %vm2542_vm14, %v1348_v42, %v1552_v32  ;;  %v1837_v26 = vsel %vm2544_vm9, %v1348_v42, %v1558_v33  ;;  %v1844_v31 = vsel %vm2546_vm15, %v1348_v42, %v1564_v34  ;;  %v2548_v0 = vld [vmem:[#allocation26_spill] sm:$0xff]  ;;  %vm2549_vm10 = vcmp.eq.s32.totalorder %v1315_v27, %v1346_v41  ;;  %v2557_v41 = vld [vmem:[#allocation23_spill] sm:$0xff] }
  0x7e   : > { %2543 = vst [vmem:[#allocation31_spill] sm:$0xff] %v1830_v25  ;;  %2545 = vst [vmem:[#allocation32_spill] sm:$0xff] %v1837_v26  ;;  %v1851_v32 = vsel %vm2549_vm10, %v1348_v42, %v2548_v0  ;;  %v2550_v25 = vld [vmem:[#allocation27_spill] sm:$0xff]  ;;  %v2551_v26 = vld [vmem:[#allocation28_spill] sm:$0xff] }
  0x7f   : > { %2547 = vst [vmem:[#allocation33_spill] sm:$0xff] %v1844_v31  ;;  %v1858_v33 = vsel %vm375_vm2, %v1348_v42, %v2550_v25  ;;  %v1865_v34 = vsel %vm376_vm3, %v1348_v42, %v2551_v26  ;;  %v2552_v31 = vld [vmem:[#allocation29_spill] sm:$0xff]  ;;  %v1879_v25 = vsel %vm378_vm5, %v1348_v42, %v1594_v46  ;;  %v1886_v26 = vsel %vm379_vm6, %v1348_v42, %v1600_v45 }
  0x80   : > { %v1872_v0 = vsel %vm377_vm4, %v1348_v42, %v2552_v31  ;;  %2554 = vst [vmem:[#allocation27_spill] sm:$0xff] %v1879_v25  ;;  %v1893_v31 = vsel %vm380_vm0, %v1348_v42, %v1606_v44  ;;  %v1900_v46 = vsel %vm381_vm1, %v1348_v42, %v1612_v43  ;;  %v2556_v25 = vld [vmem:[#allocation22_spill] sm:$0xff] }
  0x81   : > { %2553 = vst [vmem:[#allocation26_spill] sm:$0xff] %v1872_v0  ;;  %v2555_v0 = vld [vmem:[#allocation21_spill] sm:$0xff]  ;;  %vm422_vm2 = vcmp.eq.s32.totalorder %v1225_v1, %v2556_v25  ;;  %vm423_vm3 = vcmp.eq.s32.totalorder %v1228_v2, %v2556_v25  ;;  %vm424_vm4 = vcmp.eq.s32.totalorder %v1231_v3, %v2556_v25  ;;  %vm425_vm0 = vcmp.eq.s32.totalorder %v1234_v4, %v2556_v25 }
  0x82   : > { %vm426_vm5 = vcmp.eq.s32.totalorder %v1237_v5, %v2556_v25  ;;  %vm427_vm6 = vcmp.eq.s32.totalorder %v1240_v6, %v2556_v25  ;;  %vm428_vm1 = vcmp.eq.s32.totalorder %v1243_v7, %v2556_v25  ;;  %vm429_vm7 = vcmp.eq.s32.totalorder %v1246_v8, %v2556_v25 }
  0x83   : > { %vm430_vm8 = vcmp.eq.s32.totalorder %v1251_v9, %v2556_v25  ;;  %vm447_vm13 = vcmp.eq.s32.totalorder %v1318_v28, %v2556_v25  ;;  %vm448_vm14 = vcmp.eq.s32.totalorder %v1321_v29, %v2556_v25  ;;  %vm449_vm9 = vcmp.eq.s32.totalorder %v1324_v30, %v2556_v25 }
  0x84   : > { %vm450_vm15 = vcmp.eq.s32.totalorder %v1331_v35, %v2556_v25  ;;  %vm451_vm10 = vcmp.eq.s32.totalorder %v1334_v36, %v2556_v25  ;;  %vm452_vm11 = vcmp.eq.s32.totalorder %v1337_v37, %v2556_v25  ;;  %vm453_vm12 = vcmp.eq.s32.totalorder %v2555_v0, %v2556_v25 }
  0x85   : > { %v1971_v42 = vsel %vm422_vm2, %v2557_v41, %v1683_v39  ;;  %v1978_v43 = vsel %vm423_vm3, %v2557_v41, %v1690_v40  ;;  %v1985_v44 = vsel %vm424_vm4, %v2557_v41, %v1697_v38  ;;  %v1992_v45 = vsel %vm425_vm0, %v2557_v41, %v1704_v47 }
  0x86   : > { %v1999_v39 = vsel %vm426_vm5, %v2557_v41, %v1711_v48  ;;  %v2006_v38 = vsel %vm427_vm6, %v2557_v41, %v1718_v49  ;;  %v2013_v40 = vsel %vm428_vm1, %v2557_v41, %v1725_v50  ;;  %v2020_v47 = vsel %vm429_vm7, %v2557_v41, %v1732_v51 }
  0x87   : > { %v2027_v48 = vsel %vm430_vm8, %v2557_v41, %v1739_v52  ;;  %vm2558_vm2 = vcmp.eq.s32.totalorder %v1254_v10, %v2556_v25  ;;  %vm2559_vm3 = vcmp.eq.s32.totalorder %v1257_v11, %v2556_v25  ;;  %vm2560_vm4 = vcmp.eq.s32.totalorder %v1260_v12, %v2556_v25 }
  0x88   : > { %v2034_v49 = vsel %vm2558_vm2, %v2557_v41, %v1746_v53  ;;  %v2041_v50 = vsel %vm2559_vm3, %v2557_v41, %v1753_v54  ;;  %v2048_v51 = vsel %vm2560_vm4, %v2557_v41, %v1760_v55  ;;  %vm2561_vm0 = vcmp.eq.s32.totalorder %v1263_v13, %v2556_v25 }
  0x89   : > { %v2055_v52 = vsel %vm2561_vm0, %v2557_v41, %v1767_v56  ;;  %vm2562_vm5 = vcmp.eq.s32.totalorder %v1266_v14, %v2556_v25  ;;  %vm2563_vm6 = vcmp.eq.s32.totalorder %v1269_v15, %v2556_v25  ;;  %vm2564_vm1 = vcmp.eq.s32.totalorder %v1272_v16, %v2556_v25 }
  0x8a   : > { %v2062_v53 = vsel %vm2562_vm5, %v2557_v41, %v1774_v57  ;;  %v2069_v54 = vsel %vm2563_vm6, %v2557_v41, %v1781_v58  ;;  %v2076_v55 = vsel %vm2564_vm1, %v2557_v41, %v1788_v59  ;;  %vm2565_vm7 = vcmp.eq.s32.totalorder %v1278_v17, %v2556_v25 }
  0x8b   : > { %v2083_v56 = vsel %vm2565_vm7, %v2557_v41, %v1795_v60  ;;  %vm2566_vm8 = vcmp.eq.s32.totalorder %v1281_v18, %v2556_v25  ;;  %vm2568_vm2 = vcmp.eq.s32.totalorder %v1284_v19, %v2556_v25  ;;  %vm2570_vm3 = vcmp.eq.s32.totalorder %v1287_v20, %v2556_v25  ;;  %v2572_v60 = vld [vmem:[#allocation30_spill] sm:$0xff] }
  0x8c   : > { %v2090_v57 = vsel %vm2566_vm8, %v2557_v41, %v1802_v61  ;;  %v2097_v58 = vsel %vm2568_vm2, %v2557_v41, %v1809_v62  ;;  %v2104_v59 = vsel %vm2570_vm3, %v2557_v41, %v1816_v63  ;;  %vm2573_vm4 = vcmp.eq.s32.totalorder %v1301_v21, %v2556_v25 }
  0x8d   : > { %2567 = vst [vmem:[#allocation28_spill] sm:$0xff] %v2090_v57  ;;  %2569 = vst [vmem:[#allocation29_spill] sm:$0xff] %v2097_v58  ;;  %v2111_v61 = vsel %vm2573_vm4, %v2557_v41, %v2572_v60  ;;  %v2574_v57 = vld [vmem:[#allocation31_spill] sm:$0xff]  ;;  %vm2575_vm0 = vcmp.eq.s32.totalorder %v1304_v22, %v2556_v25  ;;  %v2576_v58 = vld [vmem:[#allocation32_spill] sm:$0xff]  ;;  %vm2577_vm5 = vcmp.eq.s32.totalorder %v1307_v23, %v2556_v25 }
  0x8e   : > { %2571 = vst [vmem:[#allocation21_spill] sm:$0xff] %v2104_v59  ;;  %v2118_v62 = vsel %vm2575_vm0, %v2557_v41, %v2574_v57  ;;  %v2125_v63 = vsel %vm2577_vm5, %v2557_v41, %v2576_v58  ;;  %v2578_v59 = vld [vmem:[#allocation33_spill] sm:$0xff]  ;;  %vm2579_vm6 = vcmp.eq.s32.totalorder %v1310_v24, %v2556_v25  ;;  %vm2581_vm1 = vcmp.eq.s32.totalorder %v1315_v27, %v2556_v25 }
  0x8f   : > { %v2132_v60 = vsel %vm2579_vm6, %v2557_v41, %v2578_v59  ;;  %v2139_v57 = vsel %vm2581_vm1, %v2557_v41, %v1851_v32  ;;  %v2146_v58 = vsel %vm447_vm13, %v2557_v41, %v1858_v33  ;;  %v2153_v59 = vsel %vm448_vm14, %v2557_v41, %v1865_v34  ;;  %v2587_v25 = vld [vmem:[#allocation25_spill] sm:$0xff] }
  0x90   : > { %2580 = vst [vmem:[#allocation22_spill] sm:$0xff] %v2132_v60  ;;  %2582 = vst [vmem:[#allocation23_spill] sm:$0xff] %v2139_v57  ;;  %v2583_v60 = vld [vmem:[#allocation26_spill] sm:$0xff]  ;;  %v2584_v57 = vld [vmem:[#allocation27_spill] sm:$0xff]  ;;  %v2174_v34 = vsel %vm451_vm10, %v2557_v41, %v1886_v26 }
  0x91   : > { %v2160_v32 = vsel %vm449_vm9, %v2557_v41, %v2583_v60  ;;  %v2167_v33 = vsel %vm450_vm15, %v2557_v41, %v2584_v57  ;;  %v2181_v60 = vsel %vm452_vm11, %v2557_v41, %v1893_v31  ;;  %v2188_v57 = vsel %vm453_vm12, %v2557_v41, %v1900_v46 }
  0x92   : > { %2585 = vst [vmem:[#allocation30_spill] sm:$0xff] %v2167_v33  ;;  %v2586_v33 = vld [vmem:[#allocation24_spill] sm:$0xff] }
  0x93   : > { %vm494_vm13 = vcmp.eq.s32.totalorder %v1225_v1, %v2586_v33  ;;  %vm495_vm14 = vcmp.eq.s32.totalorder %v1228_v2, %v2586_v33  ;;  %vm496_vm9 = vcmp.eq.s32.totalorder %v1231_v3, %v2586_v33  ;;  %vm497_vm11 = vcmp.eq.s32.totalorder %v1234_v4, %v2586_v33 }
  0x94   : > { %vm498_vm15 = vcmp.eq.s32.totalorder %v1237_v5, %v2586_v33  ;;  %vm499_vm10 = vcmp.eq.s32.totalorder %v1240_v6, %v2586_v33  ;;  %vm500_vm12 = vcmp.eq.s32.totalorder %v1243_v7, %v2586_v33  ;;  %vm501_vm7 = vcmp.eq.s32.totalorder %v1246_v8, %v2586_v33 }
  0x95   : > { %vm502_vm8 = vcmp.eq.s32.totalorder %v1251_v9, %v2586_v33  ;;  %vm519_vm4 = vcmp.eq.s32.totalorder %v1318_v28, %v2586_v33  ;;  %vm520_vm0 = vcmp.eq.s32.totalorder %v1321_v29, %v2586_v33  ;;  %vm521_vm5 = vcmp.eq.s32.totalorder %v1324_v30, %v2586_v33 }
  0x96   : > { %vm522_vm6 = vcmp.eq.s32.totalorder %v1331_v35, %v2586_v33  ;;  %vm523_vm1 = vcmp.eq.s32.totalorder %v1334_v36, %v2586_v33  ;;  %vm524_vm2 = vcmp.eq.s32.totalorder %v1337_v37, %v2586_v33  ;;  %vm525_vm3 = vcmp.eq.s32.totalorder %v2555_v0, %v2586_v33 }
  0x97   : > { %v2259_v26 = vsel %vm494_vm13, %v2587_v25, %v1971_v42  ;;  %v2266_v31 = vsel %vm495_vm14, %v2587_v25, %v1978_v43  ;;  %v2273_v46 = vsel %vm496_vm9, %v2587_v25, %v1985_v44  ;;  %v2280_v1 = vsel %vm497_vm11, %v2587_v25, %v1992_v45 }
  0x98   : > { %v534_v2 = vsel %vm498_vm15, %v2587_v25, %v1999_v39  ;;  %v535_v3 = vsel %vm499_vm10, %v2587_v25, %v2006_v38  ;;  %v536_v4 = vsel %vm500_vm12, %v2587_v25, %v2013_v40  ;;  %v537_v41 = vsel %vm501_vm7, %v2587_v25, %v2020_v47 }
  0x99   : > { %v538_v5 = vsel %vm502_vm8, %v2587_v25, %v2027_v48  ;;  %vm2588_vm13 = vcmp.eq.s32.totalorder %v1254_v10, %v2586_v33  ;;  %vm2589_vm14 = vcmp.eq.s32.totalorder %v1257_v11, %v2586_v33  ;;  %vm2590_vm9 = vcmp.eq.s32.totalorder %v1260_v12, %v2586_v33 }
  0x9a   : > { %v539_v6 = vsel %vm2588_vm13, %v2587_v25, %v2034_v49  ;;  %v540_v7 = vsel %vm2589_vm14, %v2587_v25, %v2041_v50  ;;  %v541_v8 = vsel %vm2590_vm9, %v2587_v25, %v2048_v51  ;;  %vm2591_vm11 = vcmp.eq.s32.totalorder %v1263_v13, %v2586_v33 }
  0x9b   : > { %v542_v9 = vsel %vm2591_vm11, %v2587_v25, %v2055_v52  ;;  %vm2592_vm15 = vcmp.eq.s32.totalorder %v1266_v14, %v2586_v33  ;;  %vm2593_vm10 = vcmp.eq.s32.totalorder %v1269_v15, %v2586_v33  ;;  %vm2594_vm12 = vcmp.eq.s32.totalorder %v1272_v16, %v2586_v33  ;;  %v2596_v14 = vld [vmem:[#allocation28_spill] sm:$0xff]  ;;  %v2598_v15 = vld [vmem:[#allocation29_spill] sm:$0xff] }
  0x9c   : > { %v543_v10 = vsel %vm2592_vm15, %v2587_v25, %v2062_v53  ;;  %v544_v11 = vsel %vm2593_vm10, %v2587_v25, %v2069_v54  ;;  %v545_v12 = vsel %vm2594_vm12, %v2587_v25, %v2076_v55  ;;  %vm2595_vm7 = vcmp.eq.s32.totalorder %v1278_v17, %v2586_v33  ;;  %v2600_v16 = vld [vmem:[#allocation21_spill] sm:$0xff] }
  0x9d   : > { %v546_v13 = vsel %vm2595_vm7, %v2587_v25, %v2083_v56  ;;  %vm2597_vm8 = vcmp.eq.s32.totalorder %v1281_v18, %v2586_v33  ;;  %vm2599_vm13 = vcmp.eq.s32.totalorder %v1284_v19, %v2586_v33  ;;  %vm2601_vm14 = vcmp.eq.s32.totalorder %v1287_v20, %v2586_v33  ;;  %v2605_v20 = vld [vmem:[#allocation22_spill] sm:$0xff] }
  0x9e   : > { %v547_v42 = vsel %vm2597_vm8, %v2587_v25, %v2596_v14  ;;  %v548_v43 = vsel %vm2599_vm13, %v2587_v25, %v2598_v15  ;;  %v549_v44 = vsel %vm2601_vm14, %v2587_v25, %v2600_v16  ;;  %vm2602_vm9 = vcmp.eq.s32.totalorder %v1301_v21, %v2586_v33  ;;  %v2607_v21 = vld [vmem:[#allocation23_spill] sm:$0xff] }
  0x9f   : > { %v550_v17 = vsel %vm2602_vm9, %v2587_v25, %v2111_v61  ;;  %vm2603_vm11 = vcmp.eq.s32.totalorder %v1304_v22, %v2586_v33  ;;  %vm2604_vm15 = vcmp.eq.s32.totalorder %v1307_v23, %v2586_v33  ;;  %vm2606_vm10 = vcmp.eq.s32.totalorder %v1310_v24, %v2586_v33 }
  0xa0   : > { %v551_v18 = vsel %vm2603_vm11, %v2587_v25, %v2118_v62  ;;  %v552_v19 = vsel %vm2604_vm15, %v2587_v25, %v2125_v63  ;;  %v553_v45 = vsel %vm2606_vm10, %v2587_v25, %v2605_v20  ;;  %vm2608_vm12 = vcmp.eq.s32.totalorder %v1315_v27, %v2586_v33  ;;  %v2609_v27 = vld [vmem:[#allocation30_spill] sm:$0xff] }
  0xa1   : > { %v554_v39 = vsel %vm2608_vm12, %v2587_v25, %v2607_v21  ;;  %v555_v22 = vsel %vm519_vm4, %v2587_v25, %v2146_v58  ;;  %v556_v23 = vsel %vm520_vm0, %v2587_v25, %v2153_v59  ;;  %v557_v24 = vsel %vm521_vm5, %v2587_v25, %v2160_v32 }
  0xa2   : > { %v558_v38 = vsel %vm522_vm6, %v2587_v25, %v2609_v27  ;;  %v559_v28 = vsel %vm523_vm1, %v2587_v25, %v2174_v34  ;;  %v560_v29 = vsel %vm524_vm2, %v2587_v25, %v2181_v60  ;;  %v561_v30 = vsel %vm525_vm3, %v2587_v25, %v2188_v57 }
  0xa3   : > { %v562_v35 = vpack.c.bf16 %v2266_v31, %v2259_v26  ;;  %v563_v36 = vpack.c.bf16 %v2280_v1, %v2273_v46  ;;  %v564_v40 = vpack.c.bf16 %v535_v3, %v534_v2  ;;  %v565_v47 = vpack.c.bf16 %v537_v41, %v536_v4 }
  0xa4   : > { %v566_v48 = vpack.c.bf16 %v539_v6, %v538_v5  ;;  %v567_v49 = vpack.c.bf16 %v541_v8, %v540_v7  ;;  %v568_v50 = vpack.c.bf16 %v543_v10, %v542_v9  ;;  %v569_v37 = vpack.c.bf16 %v545_v12, %v544_v11 }
  0xa5   : > { %v570_v51 = vpack.c.bf16 %v547_v42, %v546_v13  ;;  %v571_v52 = vpack.c.bf16 %v549_v44, %v548_v43  ;;  %v572_v53 = vpack.c.bf16 %v551_v18, %v550_v17  ;;  %v573_v54 = vpack.c.bf16 %v553_v45, %v552_v19 }
  0xa6   : > { %v574_v55 = vpack.c.bf16 %v555_v22, %v554_v39  ;;  %v575_v0 = vpack.c.bf16 %v557_v24, %v556_v23  ;;  %v576_v56 = vpack.c.bf16 %v559_v28, %v558_v38  ;;  %v577_v61 = vpack.c.bf16 %v561_v30, %v560_v29 }
  0xa8   : > { %789 = vmatprep.subr.bf16.mxu0 %v577_v61 }
  0xa9   : > { %1032 = dma.done.wait [#allocation3], 256 }
  0xaa   : > { %1033 = vsyncadd [#allocation3], 4294967040  ;;  %790 = vmatpush3.bf16.msra.mxu0 %v569_v37  ;;  %v885_v62 = vld [vmem:[#allocation2 + $0x4] ss:$8 sps:$4 sm:$0xff]   ;;  %v883_v63 = vld [vmem:[#allocation2] ss:$8 sps:$4 sm:$0xff]  }
  0xab   : > { %791 = vmatprep.subr.bf16.mxu0 %v576_v56  ;;  %626 = vmatprep.mubr.bf16.mxu0 %v885_v62  ;;  %s785_s27 = sshll.u32 %s1052_s21, 7  ;;  %s653_s28 = sshll.u32 %s2428_s26, 4  ;;  %s2438_s28 = int_to_ptr.vmem [resolvable:$true] %s653_s28 }
  0xac   : > { %s2436_s17 = scalar_lea.hbm %s2491_s4, %s785_s27  ;;  %s638_s23 = scalar_lea.sflag [#allocation8], %s1206_s7 }
  0xad   : > { %s972_s24 = scalar_lea.vmem %s2438_s28, 256  ;;  %s1066_s21 = smov [#allocation11]  }
  0xae   : > { %792 = vmatpush3.bf16.msra.mxu0 %v568_v50  ;;  %p973_p4 = scmp.ne.s32.totalorder %s2438_s28, %s972_s24  ;;  %s976_s12 = sshll.u32 %s1066_s21, 4  ;;  %s977_s12 = int_to_ptr.vmem [resolvable:$false] %s976_s12 }
  0xaf   : > { %793 = vmatprep.subr.bf16.mxu0 %v575_v0  ;;  %s978_s14 = scalar_lea.vmem %s977_s12, 512  ;;  %p979_p0 = scmp.lt.s32.totalorder %s2438_s28, %s977_s12 }
  0xb0   : > { %p974_p10 = pnand %p973_p4, %p1149_p9  ;;  %p980_p3 = scmp.lt.s32.totalorder %s978_s14, %s972_s24 }
  0xb2   : > { %794 = vmatpush3.bf16.msra.mxu0 %v567_v49  ;;  %p975_p8 = pneg %p974_p10  ;;  %p981_p13 = por %p980_p3, %p979_p0 }
  0xb3   : > { %795 = vmatprep.subr.bf16.mxu0 %v574_v55 }
  0xb4   : > { %p982_p5 = pnand %p981_p13, %p975_p8 }
  0xb6   : > { %796 = vmatpush3.bf16.msra.mxu0 %v566_v48 }
  0xb7   : > { %797 = vmatprep.subr.bf16.mxu0 %v573_v54 }
  0xba   : > { %798 = vmatpush3.bf16.msra.mxu0 %v565_v47 }
  0xbb   : > { %799 = vmatprep.subr.bf16.mxu0 %v572_v53 }
  0xbe   : > { %800 = vmatpush3.bf16.msra.mxu0 %v564_v40 }
  0xbf   : > { %801 = vmatprep.subr.bf16.mxu0 %v571_v52 }
  0xc2   : > { %802 = vmatpush3.bf16.msra.mxu0 %v563_v36 }
  0xc3   : > { %803 = vmatprep.subr.bf16.mxu0 %v570_v51 }
  0xc6   : > { %804 = vmatpush3.bf16.msra.mxu0 %v562_v35 }
  0xc9   : > { %627 = vmatmul.mubr.bf16.vlgmr.msra.gmra.mxu0 %v883_v63 }
 0x189   : > { %v805_v58 = vpop.f32.mrf.mxu0 }
 0x18b   : > { %v806_v59 = vpop.f32.mrf.mxu0 }
 0x18c   : > { %v807_v32 = vadd.f32 %v806_v59, %v805_v58 }
 0x18d   : > { %v808_v33 = vpop.f32.mrf.mxu0 }
 0x18e   : > { %635 = vst [vmem:[%s2428_s26] sm:$0xff] %v807_v32 }
 0x18f   : > { %v809_v34 = vpop.f32.mrf.mxu0 }
 0x190   : > { %v810_v60 = vadd.f32 %v809_v34, %v808_v33 }
 0x192   : > { %636 = vst [vmem:[%s2428_s26 + $0x8] sm:$0xff] %v810_v60 }
 0x193   : > { %985 = shalt.err (!%p982_p5)
}
 0x194   : > { %s986_s16 = scalar_lea.hbm %s2436_s17, 256  ;;  %s990_s15 = scalar_lea.hbm %s2491_s4, 512 }
 0x195   : > { %p987_p12 = scmp.ne.s32.totalorder %s2436_s17, %s986_s16  ;;  %p991_p1 = scmp.lt.s32.totalorder %s2436_s17, %s2491_s4 }
 0x196   : > { %p992_p2 = scmp.lt.s32.totalorder %s990_s15, %s986_s16 }
 0x197   : > { %p988_p6 = pnand %p987_p12, %p1149_p9 }
 0x198   : > { %p993_p4 = por %p992_p2, %p991_p1 }
 0x199   : > { %p989_p7 = pneg %p988_p6 }
 0x19b   : > { %p994_p10 = pnand %p993_p4, %p989_p7 }
 0x19d   : > { %997 = shalt.err (!%p994_p10)
}
 0x19e   : > { %s1067_s26 = smov 128   ;;  %s1068_s27 = smov 256  }
 0x19f   : > { %s1069_s13 = smov 8  }
 0x1a0   : > { %815 = dma.vmem_to_hbm [thread:$0]  (%p1149_p9), %s2438_s28, 256, %s2436_s17, %s638_s23, %s1067_s26, %s1068_s27, %s1069_s13  }
 0x1a1 PF: > { %s668_s29 = sand.u32 1, %s1040_s18   ;;  %p2610_p8 = scmp.ge.s32.totalorder %s1060_s0, 2 }
 0x1a2   : > { %s669_s24 = scalar_lea.sflag [#allocation8], %s668_s29 }
 0x1a3   : > { %p825_p0 = pnand %p2610_p8, %p1156_p11 }
 0x1a5   : > { %p826_p3 = pneg %p825_p0 }
 0x1a7   : > { %1035 = dma.done.wait (%p826_p3), %s669_s24, 256  }
 0x1a8   : > { %1037 = vsyncadd (%p826_p3), %s669_s24, 4294967040  ;;  %s27_s0 = sadd.s32 1, %s1060_s0   ;;  %s2611_s18 = smov %s1044_s19 }
 0x1a9   : > { %p24_p13 = scmp.ge.s32.totalorder %s27_s0, 4   ;;  %s2612_s19 = smov %s1048_s20 }
 0x1aa   : > { %s2613_s20 = smov %s1154_s5  ;;  %s2614_s21 = smov %s1056_s22 }
 0x1ab   : > { %s2615_s22 = smov %s2617_s25  ;;  %26 = sbr.rel (!%p24_p13) target bundleno = 13 (0xd), region = 91 }
 0x1b0   :  { %674 = vsyncpa [#allocation7], 1 }
 0x1b1   :  { %676 = vsyncpa [#allocation7 + $0x1], 1 }
 0x1b2   :  { %677 = vsyncpa [#allocation10], 1 }
 0x1b3   :  { %679 = vsyncpa [#allocation10 + $0x1], 1 }
 0x1b4   :  { %680 = vsyncpa [#allocation8], 1 }
 0x1b5   :  { %682 = vsyncpa [#allocation8 + $0x1], 1 }
 0x1b6   :  { %683 = vsyncmov [#allocation3] }
 0x1b9   :  { %s684_s30 = vpop.sfrf %683 }
 0x1ba   :  { %p788_p9 = scmp.ne.s32.totalorder %s684_s30, 0 }
 0x1bc   :  { %688 = shalt.err (%p788_p9)  }

</bundles_post_ra>
